<compile_context>
chip_gen: v7x
topology: tpu7x:2x2x1
jax: 0.10.0
libtpu: 0.0.40
codegen_flags: <defaults>
</compile_context>

<pallas_src>
import functools

import jax
import jax.numpy as jnp
from jax.experimental import pallas as pl
from jax.experimental.pallas import tpu as pltpu


def _latent_encoder_kernel(z_ref, w1_ref, b1_ref, w2_ref, b2_ref, w3_ref, b3_ref,
                           out_ref, *, act_dtype):
    """Fused MLP: Linear -> LeakyReLU(0.2) -> Linear -> LeakyReLU(0.2) -> Linear.

    Matmuls run with bf16 inputs and f32 MXU accumulation. Bias add + LeakyReLU
    of the hidden layers run in `act_dtype` (bf16 on v6e/v7x halves vreg/VMEM
    traffic of the [tile_b, hidden] temporaries; use f32 on v5e).
    """
    z = z_ref[...].astype(jnp.bfloat16)

    # Layer 1: Linear(latent_dim, hidden_dim) + LeakyReLU(0.2)
    h1 = jnp.dot(z, w1_ref[...], preferred_element_type=jnp.float32)
    h1 = h1.astype(act_dtype) + b1_ref[...].astype(act_dtype)
    h1 = jnp.maximum(h1, 0.2 * h1)              # LeakyReLU(0.2): vmul + vmax

    # Layer 2: Linear(hidden_dim, hidden_dim) + LeakyReLU(0.2)
    h2 = jnp.dot(h1.astype(jnp.bfloat16), w2_ref[...],
                 preferred_element_type=jnp.float32)
    h2 = h2.astype(act_dtype) + b2_ref[...].astype(act_dtype)
    h2 = jnp.maximum(h2, 0.2 * h2)

    # Layer 3: Linear(hidden_dim, latent_dim), no activation; bias add in f32.
    out = jnp.dot(h2.astype(jnp.bfloat16), w3_ref[...],
                  preferred_element_type=jnp.float32)
    out = out + b3_ref[...]
    out_ref[...] = out.astype(out_ref.dtype)


# Conservative budget so a config that runs on v5e/v6e (128 MiB VMEM) does not
# blow up on v7x (64 MiB physical VMEM).
_VMEM_BUDGET_BYTES = 40 << 20


def _vmem_bytes_needed(tile_b, latent_dim, hidden_dim, *, act_bytes,
                       zout_buffers=2):
    """Rough VMEM footprint for one pipelined step at a given batch tile."""
    w_bytes = 2 * (latent_dim * hidden_dim + hidden_dim * hidden_dim
                   + hidden_dim * latent_dim)          # bf16, single-buffered
    b_bytes = 4 * (2 * hidden_dim + latent_dim)        # f32 bias rows
    io_bytes = 2 * zout_buffers * tile_b * latent_dim * 4   # z + out tiles
    tmp_bytes = tile_b * hidden_dim * 4 + 2 * tile_b * hidden_dim * act_bytes
    return w_bytes + b_bytes + io_bytes + tmp_bytes


def _pick_tile_b(B, latent_dim, hidden_dim, *, act_bytes):
    """Pick the batch tile.

    * B <= 256: one whole-batch block (no pointless grid-step overhead /
      tiny-M MXU passes on the single-TC chips).
    * Otherwise: biggest of (2048, 1024, 512, 256, 128) dividing B, but prefer
      a tile >= 256 rows that yields >= 4 grid steps (v7x megacore: each TC
      gets >= 2 steps and can still pipeline its z/out DMA).
    * Shrink if the VMEM budget would be exceeded.
    """
    if B <= 256:
        tile = B
    else:
        candidates = [t for t in (2048, 1024, 512, 256, 128) if B % t == 0]
        if candidates:
            tile = candidates[0]
            for t in candidates:
                if t >= 256 and B // t >= 4:
                    tile = t
                    break
        else:
            tile = next((t for t in (64, 32, 16, 8) if B % t == 0), B)

    # TODO(synk): add a hidden-dim tiling axis instead of only shrinking tile_b
    # once hidden_dim grows large enough that resident weights dominate VMEM.
    while (tile > 128 and B % (tile // 2) == 0
           and _vmem_bytes_needed(tile, latent_dim, hidden_dim,
                                  act_bytes=act_bytes) > _VMEM_BUDGET_BYTES):
        tile //= 2
    return tile


def latent_encoder(z, params, *, tile_b=None, act_dtype=jnp.bfloat16):
    """Apply LatentEncoder forward pass with a fused Pallas kernel.

    z: [B, latent_dim] float32 (or bf16 if the surrounding graph provides it).
    params: dict with w1[in,hid], b1[1,hid], w2[hid,hid], b2[1,hid],
            w3[hid,latent], b3[1,latent]; weights bf16 (pre-transposed to
            [in, out]), biases f32.
    act_dtype: dtype of the hidden bias+LeakyReLU path (bf16 for v6e/v7x,
            jnp.float32 for v5e).
    """
    B, latent_dim = z.shape
    hidden_dim = params["w1"].shape[1]
    act_bytes = jnp.dtype(act_dtype).itemsize

    if tile_b is None:
        tile_b = _pick_tile_b(B, latent_dim, hidden_dim, act_bytes=act_bytes)
    assert B % tile_b == 0, "batch must be divisible by tile_b"
    # (8,128) block constraint: sublane dim must be a multiple of 8 or full dim.
    assert tile_b % 8 == 0 or tile_b == B, \
        "tile_b must be a multiple of 8 (or equal to the full batch)"

    grid = (B // tile_b,)

    # Weights/biases are grid-invariant -> single-buffered, replicated blocks.
    resident = lambda shape: pl.BlockSpec(
        shape, lambda i: (0, 0), pipeline_mode=pl.Buffered(buffer_count=1))

    # Advisory cost estimate for XLA scheduling around the custom call.
    flops = 2 * B * (latent_dim * hidden_dim
                     + hidden_dim * hidden_dim
                     + hidden_dim * latent_dim)
    bytes_accessed = (
        z.size * z.dtype.itemsize
        + B * latent_dim * z.dtype.itemsize                      # output
        + sum(int(params[k].size) * params[k].dtype.itemsize
              for k in ("w1", "b1", "w2", "b2", "w3", "b3")))
    cost = pl.CostEstimate(flops=flops, transcendentals=0,
                           bytes_accessed=bytes_accessed)

    need = _vmem_bytes_needed(tile_b, latent_dim, hidden_dim,
                              act_bytes=act_bytes)
    # Headroom over the estimate, but capped v7x-safely (64 MiB physical).
    vmem_limit = int(min(max(need + (8 << 20), 32 << 20), 48 << 20))

    kernel = functools.partial(_latent_encoder_kernel, act_dtype=act_dtype)

    return pl.pallas_call(
        kernel,
        out_shape=jax.ShapeDtypeStruct((B, latent_dim), z.dtype),
        grid_spec=pltpu.PrefetchScalarGridSpec(
            num_scalar_prefetch=0,
            grid=grid,
            in_specs=[
                pl.BlockSpec((tile_b, latent_dim), lambda i: (i, 0)),   # z
                resident((latent_dim, hidden_dim)),                      # w1
                resident((1, hidden_dim)),                               # b1
                resident((hidden_dim, hidden_dim)),                      # w2
                resident((1, hidden_dim)),                               # b2
                resident((hidden_dim, latent_dim)),                      # w3
                resident((1, latent_dim)),                               # b3
            ],
            out_specs=pl.BlockSpec((tile_b, latent_dim), lambda i: (i, 0)),
        ),
        compiler_params=pltpu.CompilerParams(
            dimension_semantics=("parallel",),
            vmem_limit_bytes=vmem_limit),
        cost_estimate=cost,
    )(z, params["w1"], params["b1"], params["w2"], params["b2"],
      params["w3"], params["b3"])


def init_params(key, latent_dim, hidden_dim):
    """Deterministic init matching nn.Linear shapes (uniform +/- 1/sqrt(fan_in)).

    Weights are stored [in, out] (transposed vs. PyTorch [out, in]) in bf16;
    biases stay f32 (the kernel casts them as needed)."""
    ks = jax.random.split(key, 6)

    def linear(kw, kb, fan_in, fan_out):
        bound = float(fan_in) ** -0.5
        w = jax.random.uniform(kw, (fan_in, fan_out), jnp.float32, -bound, bound)
        b = jax.random.uniform(kb, (1, fan_out), jnp.float32, -bound, bound)
        return w.astype(jnp.bfloat16), b

    w1, b1 = linear(ks[0], ks[1], latent_dim, hidden_dim)
    w2, b2 = linear(ks[2], ks[3], hidden_dim, hidden_dim)
    w3, b3 = linear(ks[4], ks[5], hidden_dim, latent_dim)
    return {"w1": w1, "b1": b1, "w2": w2, "b2": b2, "w3": w3, "b3": b3}


def latent_encoder_ref(z, p):
    """Pure-JAX f32 reference of the PyTorch forward (weights upcast to f32)."""
    leaky = lambda x: jnp.where(x > 0, x, 0.2 * x)
    w1 = p["w1"].astype(jnp.float32)
    w2 = p["w2"].astype(jnp.float32)
    w3 = p["w3"].astype(jnp.float32)
    h = leaky(z @ w1 + p["b1"])
    h = leaky(h @ w2 + p["b2"])
    return h @ w3 + p["b3"]


if __name__ == "__main__":
    latent_dim = 128
    hidden_dim = 256
    batch = 16   # B <= 256 -> single whole-batch block, grid=(1,)

    key = jax.random.PRNGKey(0)
    kz, kp = jax.random.split(key)
    z = jax.random.normal(kz, (batch, latent_dim), dtype=jnp.float32)
    params = init_params(kp, latent_dim, hidden_dim)

    out = jax.block_until_ready(latent_encoder(z, params))

    ref = latent_encoder_ref(z, params)
    assert out.shape == (batch, latent_dim)
    # bf16 weights/activations with f32 accumulation: loosened tolerance vs f32 ref.
    assert jnp.allclose(out, ref, atol=5e-2, rtol=5e-2), "mismatch vs reference"

    print("KERNEL_OK")
</pallas_src>

<mosaic_0001>
module attributes {stable_mosaic.version = 11 : i64} {
  func.func @_latent_encoder_kernel(%arg0: i32, %arg1: memref<16x128xf32, #tpu.memory_space<vmem>>, %arg2: memref<128x256xbf16, #tpu.memory_space<vmem>>, %arg3: memref<1x256xf32, #tpu.memory_space<vmem>>, %arg4: memref<256x256xbf16, #tpu.memory_space<vmem>>, %arg5: memref<1x256xf32, #tpu.memory_space<vmem>>, %arg6: memref<256x128xbf16, #tpu.memory_space<vmem>>, %arg7: memref<1x128xf32, #tpu.memory_space<vmem>>, %arg8: memref<16x128xf32, #tpu.memory_space<vmem>>) attributes {dimension_semantics = [#tpu.dimension_semantics<parallel>], iteration_bounds = array<i64: 1>, scalar_prefetch = 0 : i64, scratch_operands = 0 : i64, tpu.core_type = #tpu.core_type<tc>, window_params = [{transform_indices = @transform_0, window_bounds = array<i64: 16, 128>}, {pipeline_mode = #tpu.pipeline_mode<synchronous>, transform_indices = @transform_1, window_bounds = array<i64: 128, 256>}, {pipeline_mode = #tpu.pipeline_mode<synchronous>, transform_indices = @transform_2, window_bounds = array<i64: 1, 256>}, {pipeline_mode = #tpu.pipeline_mode<synchronous>, transform_indices = @transform_3, window_bounds = array<i64: 256, 256>}, {pipeline_mode = #tpu.pipeline_mode<synchronous>, transform_indices = @transform_4, window_bounds = array<i64: 1, 256>}, {pipeline_mode = #tpu.pipeline_mode<synchronous>, transform_indices = @transform_5, window_bounds = array<i64: 256, 128>}, {pipeline_mode = #tpu.pipeline_mode<synchronous>, transform_indices = @transform_6, window_bounds = array<i64: 1, 128>}, {transform_indices = @transform_7, window_bounds = array<i64: 16, 128>}]} {
    %c0 = arith.constant 0 : index
    %c0_0 = arith.constant 0 : index
    %0 = vector.load %arg1[%c0, %c0_0] : memref<16x128xf32, #tpu.memory_space<vmem>>, vector<16x128xf32>
    %1 = arith.truncf %0 : vector<16x128xf32> to vector<16x128xbf16>
    %c0_1 = arith.constant 0 : index
    %c0_2 = arith.constant 0 : index
    %2 = vector.load %arg2[%c0_1, %c0_2] : memref<128x256xbf16, #tpu.memory_space<vmem>>, vector<128x256xbf16>
    %cst = arith.constant dense<0.000000e+00> : vector<16x256xf32>
    %3 = tpu.matmul %1, %2, %cst {dimension_numbers = #tpu.dot_dimension_numbers<[1], [0], [0], [1], [0, 0, 1, 1], [], []>} : vector<16x128xbf16>, vector<128x256xbf16>, vector<16x256xf32> -> vector<16x256xf32>
    %4 = arith.truncf %3 : vector<16x256xf32> to vector<16x256xbf16>
    %c0_3 = arith.constant 0 : index
    %c0_4 = arith.constant 0 : index
    %5 = vector.load %arg3[%c0_3, %c0_4] : memref<1x256xf32, #tpu.memory_space<vmem>>, vector<1x256xf32>
    %6 = arith.truncf %5 : vector<1x256xf32> to vector<1x256xbf16>
    %7 = vector.broadcast %6 : vector<1x256xbf16> to vector<16x256xbf16>
    %8 = arith.addf %4, %7 : vector<16x256xbf16>
    %cst_5 = arith.constant 2.001950e-01 : bf16
    %9 = vector.broadcast %cst_5 : bf16 to vector<16x256xbf16>
    %10 = arith.mulf %9, %8 : vector<16x256xbf16>
    %11 = arith.maximumf %8, %10 : vector<16x256xbf16>
    %c0_6 = arith.constant 0 : index
    %c0_7 = arith.constant 0 : index
    %12 = vector.load %arg4[%c0_6, %c0_7] : memref<256x256xbf16, #tpu.memory_space<vmem>>, vector<256x256xbf16>
    %cst_8 = arith.constant dense<0.000000e+00> : vector<16x256xf32>
    %13 = tpu.matmul %11, %12, %cst_8 {dimension_numbers = #tpu.dot_dimension_numbers<[1], [0], [0], [1], [0, 0, 1, 1], [], []>} : vector<16x256xbf16>, vector<256x256xbf16>, vector<16x256xf32> -> vector<16x256xf32>
    %14 = arith.truncf %13 : vector<16x256xf32> to vector<16x256xbf16>
    %c0_9 = arith.constant 0 : index
    %c0_10 = arith.constant 0 : index
    %15 = vector.load %arg5[%c0_9, %c0_10] : memref<1x256xf32, #tpu.memory_space<vmem>>, vector<1x256xf32>
    %16 = arith.truncf %15 : vector<1x256xf32> to vector<1x256xbf16>
    %17 = vector.broadcast %16 : vector<1x256xbf16> to vector<16x256xbf16>
    %18 = arith.addf %14, %17 : vector<16x256xbf16>
    %cst_11 = arith.constant 2.001950e-01 : bf16
    %19 = vector.broadcast %cst_11 : bf16 to vector<16x256xbf16>
    %20 = arith.mulf %19, %18 : vector<16x256xbf16>
    %21 = arith.maximumf %18, %20 : vector<16x256xbf16>
    %c0_12 = arith.constant 0 : index
    %c0_13 = arith.constant 0 : index
    %22 = vector.load %arg6[%c0_12, %c0_13] : memref<256x128xbf16, #tpu.memory_space<vmem>>, vector<256x128xbf16>
    %cst_14 = arith.constant dense<0.000000e+00> : vector<16x128xf32>
    %23 = tpu.matmul %21, %22, %cst_14 {dimension_numbers = #tpu.dot_dimension_numbers<[1], [0], [0], [1], [0, 0, 1, 1], [], []>} : vector<16x256xbf16>, vector<256x128xbf16>, vector<16x128xf32> -> vector<16x128xf32>
    %c0_15 = arith.constant 0 : index
    %c0_16 = arith.constant 0 : index
    %24 = vector.load %arg7[%c0_15, %c0_16] : memref<1x128xf32, #tpu.memory_space<vmem>>, vector<1x128xf32>
    %25 = vector.broadcast %24 : vector<1x128xf32> to vector<16x128xf32>
    %26 = arith.addf %23, %25 : vector<16x128xf32>
    %c0_17 = arith.constant 0 : index
    %c0_18 = arith.constant 0 : index
    %27 = vector.load %arg8[%c0_17, %c0_18] : memref<16x128xf32, #tpu.memory_space<vmem>>, vector<16x128xf32>
    tpu.vector_store %arg8[%c0_17, %c0_18], %26 {strides = array<i32>} : memref<16x128xf32, #tpu.memory_space<vmem>>, vector<16x128xf32>,
    return
  }
  func.func @transform_0(%arg0: i32) -> (i32, i32) {
    %c0_i32 = arith.constant 0 : i32
    %c0_i32_0 = arith.constant 0 : i32
    return %arg0, %c0_i32 : i32, i32
  }
  func.func @transform_1(%arg0: i32) -> (i32, i32) {
    %c0_i32 = arith.constant 0 : i32
    %c0_i32_0 = arith.constant 0 : i32
    %c0_i32_1 = arith.constant 0 : i32
    return %c0_i32, %c0_i32_0 : i32, i32
  }
  func.func @transform_2(%arg0: i32) -> (i32, i32) {
    %c0_i32 = arith.constant 0 : i32
    %c0_i32_0 = arith.constant 0 : i32
    %c0_i32_1 = arith.constant 0 : i32
    return %c0_i32, %c0_i32_0 : i32, i32
  }
  func.func @transform_3(%arg0: i32) -> (i32, i32) {
    %c0_i32 = arith.constant 0 : i32
    %c0_i32_0 = arith.constant 0 : i32
    %c0_i32_1 = arith.constant 0 : i32
    return %c0_i32, %c0_i32_0 : i32, i32
  }
  func.func @transform_4(%arg0: i32) -> (i32, i32) {
    %c0_i32 = arith.constant 0 : i32
    %c0_i32_0 = arith.constant 0 : i32
    %c0_i32_1 = arith.constant 0 : i32
    return %c0_i32, %c0_i32_0 : i32, i32
  }
  func.func @transform_5(%arg0: i32) -> (i32, i32) {
    %c0_i32 = arith.constant 0 : i32
    %c0_i32_0 = arith.constant 0 : i32
    %c0_i32_1 = arith.constant 0 : i32
    return %c0_i32, %c0_i32_0 : i32, i32
  }
  func.func @transform_6(%arg0: i32) -> (i32, i32) {
    %c0_i32 = arith.constant 0 : i32
    %c0_i32_0 = arith.constant 0 : i32
    %c0_i32_1 = arith.constant 0 : i32
    return %c0_i32, %c0_i32_0 : i32, i32
  }
  func.func @transform_7(%arg0: i32) -> (i32, i32) {
    %c0_i32 = arith.constant 0 : i32
    %c0_i32_0 = arith.constant 0 : i32
    return %arg0, %c0_i32 : i32, i32
  }
}

</mosaic_0001>

<bundles_post_ra>
// kernel: tpu_custom_call.1
= control target key start
LH: loop header
LB: loop body
LE: loop exit
PB: predicated region body
PF: predicated region fallthrough
CT: control target
= control target key end

     0   :  { %12 = vsyncpa [#allocation3], 0  ;;  %s1178_s0 = inlined_call_operand.hbm [shape: f32[16,128], index: 0, kind: input, shape index: {}]   ;;  %s1179_s1 = inlined_call_operand.hbm [shape: bf16[128,256], index: 1, kind: input, shape index: {}]   ;;  %s1180_s2 = inlined_call_operand.vmem [shape: f32[1,256], index: 2, kind: input, shape index: {}]   ;;  %s1181_s3 = inlined_call_operand.hbm [shape: bf16[256,256], index: 3, kind: input, shape index: {}]   ;;  %s1182_s4 = inlined_call_operand.vmem [shape: f32[1,256], index: 4, kind: input, shape index: {}]   ;;  %s1183_s5 = inlined_call_operand.hbm [shape: bf16[256,128], index: 5, kind: input, shape index: {}]   ;;  %s1184_s6 = inlined_call_operand.vmem [shape: f32[1,128], index: 6, kind: input, shape index: {}]   ;;  %s1185_s7 = inlined_call_operand.hbm [shape: f32[16,128], index: 7, kind: output, shape index: {}]  }
   0x1   :  { %13 = vsyncpa [#allocation6], 0 }
   0x2   :  { %14 = vsyncpa [#allocation9], 0 }
   0x3   :  { %15 = vsyncpa [#allocation4], 0  ;;  %s1033_s24 = smov [#allocation5]   ;;  %s1034_s26 = smov [#allocation2]  }
   0x4   :  { %s33_s25 = sshll.u32 %s1033_s24, 4  ;;  %s21_s27 = sshll.u32 %s1034_s26, 4  ;;  %s34_s25 = int_to_ptr.vmem [resolvable:$true] %s33_s25  ;;  %s1083_s27 = int_to_ptr.vmem [resolvable:$true] %s21_s27 }
   0x5   :  { %s915_s30 = scalar_lea.hbm %s1179_s1, 2048 }
   0x6   :  { %p916_p0 = scmp.ne.s32.totalorder %s1179_s1, %s915_s30  ;;  %p919_p1 = scmp.lt.u32.totalorder %s915_s30, %s1179_s1 }
   0x8   :  { %p921_p2 = pnand %p919_p1, %p916_p0 }
   0xa   :  { %924 = shalt.err (!%p921_p2)
}
   0xb   :  { %s925_s12 = scalar_lea.vmem %s34_s25, 2048  ;;  %p930_p4 = scmp.lt.s32.totalorder %s34_s25, %s34_s25 }
   0xc   :  { %p926_p3 = scmp.ne.s32.totalorder %s34_s25, %s925_s12  ;;  %p931_p5 = scmp.lt.s32.totalorder %s925_s12, %s925_s12 }
   0xe   :  { %p932_p6 = por %p931_p5, %p930_p4 }
  0x10   :  { %p933_p7 = pnand %p932_p6, %p926_p3 }
  0x12   :  { %936 = shalt.err (!%p933_p7)
}
  0x13   :  { %s1035_s13 = smov 128   ;;  %s1036_s14 = smov 8  }
  0x14   :  { %39 = dma.hbm_to_vmem [thread:$0]  %s1179_s1, 2048, %s34_s25, [#allocation6], %s1035_s13, %s1035_s13, %s1036_s14  }
  0x15   :  { %s937_s19 = scalar_lea.hbm %s1178_s0, 256 }
  0x16   :  { %p938_p8 = scmp.ne.s32.totalorder %s1178_s0, %s937_s19  ;;  %p941_p9 = scmp.lt.u32.totalorder %s937_s19, %s1178_s0 }
  0x18   :  { %p943_p10 = pnand %p941_p9, %p938_p8 }
  0x1a   :  { %946 = shalt.err (!%p943_p10)
}
  0x1b   :  { %s947_s24 = scalar_lea.vmem %s1083_s27, 256  ;;  %p952_p12 = scmp.lt.s32.totalorder %s1083_s27, %s1083_s27 }
  0x1c   :  { %p948_p11 = scmp.ne.s32.totalorder %s1083_s27, %s947_s24  ;;  %p953_p13 = scmp.lt.s32.totalorder %s947_s24, %s947_s24 }
  0x1e   :  { %p954_p0 = por %p953_p13, %p952_p12 }
  0x20   :  { %p955_p1 = pnand %p954_p0, %p948_p11 }
  0x22   :  { %958 = shalt.err (!%p955_p1)
}
  0x23   :  { %27 = dma.hbm_to_vmem [thread:$0]  %s1178_s0, 256, %s1083_s27, [#allocation3], %s1035_s13, %s1035_s13, %s1036_s14  }
  0x24   :  { %s1037_s26 = smov [#allocation7]   ;;  %s1038_s29 = smov [#allocation8]  }
  0x25   :  { %s47_s28 = sshll.u32 %s1037_s26, 4  ;;  %s61_s30 = sshll.u32 %s1038_s29, 4  ;;  %s48_s28 = int_to_ptr.vmem [resolvable:$true] %s47_s28  ;;  %s1120_s30 = int_to_ptr.vmem [resolvable:$true] %s61_s30 }
  0x26   :  { %s959_s10 = scalar_lea.hbm %s1181_s3, 4096 }
  0x27   :  { %p960_p2 = scmp.ne.s32.totalorder %s1181_s3, %s959_s10  ;;  %p963_p3 = scmp.lt.u32.totalorder %s959_s10, %s1181_s3 }
  0x29   :  { %p965_p4 = pnand %p963_p3, %p960_p2 }
  0x2b   :  { %968 = shalt.err (!%p965_p4)
}
  0x2c   :  { %s969_s0 = scalar_lea.vmem %s48_s28, 4096  ;;  %p974_p6 = scmp.lt.s32.totalorder %s48_s28, %s48_s28 }
  0x2d   :  { %p970_p5 = scmp.ne.s32.totalorder %s48_s28, %s969_s0  ;;  %p975_p7 = scmp.lt.s32.totalorder %s969_s0, %s969_s0 }
  0x2f   :  { %p976_p8 = por %p975_p7, %p974_p6 }
  0x31   :  { %p977_p9 = pnand %p976_p8, %p970_p5 }
  0x33   :  { %980 = shalt.err (!%p977_p9)
}
  0x34   :  { %53 = dma.hbm_to_vmem [thread:$0]  %s1181_s3, 4096, %s48_s28, [#allocation6], %s1035_s13, %s1035_s13, %s1036_s14  }
  0x35   :  { %s981_s20 = scalar_lea.hbm %s1183_s5, 2048 }
  0x36   :  { %p982_p10 = scmp.ne.s32.totalorder %s1183_s5, %s981_s20  ;;  %p985_p11 = scmp.lt.u32.totalorder %s981_s20, %s1183_s5 }
  0x38   :  { %p987_p12 = pnand %p985_p11, %p982_p10 }
  0x3a   :  { %990 = shalt.err (!%p987_p12)
}
  0x3b   :  { %s991_s1 = scalar_lea.vmem %s1120_s30, 2048  ;;  %p996_p0 = scmp.lt.s32.totalorder %s1120_s30, %s1120_s30 }
  0x3c   :  { %p992_p13 = scmp.ne.s32.totalorder %s1120_s30, %s991_s1  ;;  %p997_p1 = scmp.lt.s32.totalorder %s991_s1, %s991_s1 }
  0x3e   :  { %p998_p2 = por %p997_p1, %p996_p0 }
  0x40   :  { %p999_p3 = pnand %p998_p2, %p992_p13 }
  0x42   :  { %1002 = shalt.err (!%p999_p3)
}
  0x43   :  { %s1039_s3 = smov 64   ;;  %s1040_s25 = smov 4  }
  0x44   :  { %67 = dma.hbm_to_vmem [thread:$0]  %s1183_s5, 2048, %s1120_s30, [#allocation9], %s1039_s3, %s1039_s3, %s1040_s25  }
  0x45   :  { %1025 = dma.done.wait [#allocation3], 256  }
  0x46   :  { %1026 = vsyncadd [#allocation3], 4294967040 }
  0x47   :  { %1027 = dma.done.wait [#allocation6], 6144  }
  0x48   :  { %1028 = vsyncadd [#allocation6], 4294961152 }
  0x49   :  { %1029 = dma.done.wait [#allocation9], 2048  }
  0x4a   :  { %1030 = vsyncadd [#allocation9], 4294965248  ;;  %v1041_v0 = vmov 0   ;;  %v827_v1 = vld [vmem:[#allocation5 + $0x4] ss:$8 sps:$4 sm:$0xff]   ;;  %v84_v26 = vld [vmem:[#allocation2] sm:$0xff]  ;;  %v230_v62 = vlaneseq }
  0x4b   :  { %215 = vmatprep.mubr.bf16.mxu0 %v1041_v0  ;;  %v829_v2 = vld [vmem:[#allocation5] ss:$8 sps:$4 sm:$0xff]   ;;  %183 = vmatprep.subr.bf16.mxu0 %v827_v1  ;;  %v830_v3 = vld [vmem:[#allocation5 + $0x14] ss:$8 sps:$4 sm:$0xff]   ;;  %v832_v4 = vld [vmem:[#allocation5 + $0x10] ss:$8 sps:$4 sm:$0xff]  }
  0x4c   :  { %184 = vmatpush1.bf16.msra.mxu0 %v829_v2  ;;  %v833_v5 = vld [vmem:[#allocation5 + $0x24] ss:$8 sps:$4 sm:$0xff]   ;;  %v835_v6 = vld [vmem:[#allocation5 + $0x20] ss:$8 sps:$4 sm:$0xff]   ;;  %v836_v7 = vld [vmem:[#allocation5 + $0x34] ss:$8 sps:$4 sm:$0xff]  }
  0x4d   :  { %185 = vmatprep.subr.bf16.mxu0 %v830_v3  ;;  %v838_v8 = vld [vmem:[#allocation5 + $0x30] ss:$8 sps:$4 sm:$0xff]   ;;  %v839_v9 = vld [vmem:[#allocation5 + $0x44] ss:$8 sps:$4 sm:$0xff]   ;;  %v853_v11 = vld [vmem:[#allocation7] ss:$8 sps:$4 sm:$0xff]  }
  0x4e   :  { %v851_v10 = vld [vmem:[#allocation7 + $0x4] ss:$8 sps:$4 sm:$0xff]   ;;  %v854_v12 = vld [vmem:[#allocation7 + $0x14] ss:$8 sps:$4 sm:$0xff]   ;;  %v841_v13 = vld [vmem:[#allocation5 + $0x40] ss:$8 sps:$4 sm:$0xff]  }
  0x4f   :  { %454 = vmatprep.subr.bf16.mxu1 %v851_v10  ;;  %v856_v14 = vld [vmem:[#allocation7 + $0x10] ss:$8 sps:$4 sm:$0xff]   ;;  %v842_v15 = vld [vmem:[#allocation5 + $0x54] ss:$8 sps:$4 sm:$0xff]   ;;  %v857_v16 = vld [vmem:[#allocation7 + $0x24] ss:$8 sps:$4 sm:$0xff]  }
  0x50   :  { %186 = vmatpush1.bf16.msra.mxu0 %v832_v4  ;;  %455 = vmatpush1.bf16.msra.mxu1 %v853_v11  ;;  %v844_v17 = vld [vmem:[#allocation5 + $0x50] ss:$8 sps:$4 sm:$0xff]   ;;  %v859_v18 = vld [vmem:[#allocation7 + $0x20] ss:$8 sps:$4 sm:$0xff]   ;;  %v845_v19 = vld [vmem:[#allocation5 + $0x64] ss:$8 sps:$4 sm:$0xff]  }
  0x51   :  { %187 = vmatprep.subr.bf16.mxu0 %v833_v5  ;;  %456 = vmatprep.subr.bf16.mxu1 %v854_v12  ;;  %v860_v20 = vld [vmem:[#allocation7 + $0x34] ss:$8 sps:$4 sm:$0xff]   ;;  %v847_v21 = vld [vmem:[#allocation5 + $0x60] ss:$8 sps:$4 sm:$0xff]   ;;  %v862_v22 = vld [vmem:[#allocation7 + $0x30] ss:$8 sps:$4 sm:$0xff]  }
  0x52   :  { %v848_v23 = vld [vmem:[#allocation5 + $0x74] ss:$8 sps:$4 sm:$0xff]   ;;  %v863_v24 = vld [vmem:[#allocation7 + $0x44] ss:$8 sps:$4 sm:$0xff]   ;;  %v850_v25 = vld [vmem:[#allocation5 + $0x70] ss:$8 sps:$4 sm:$0xff]  }
  0x53   :  { %v85_v27 = vld [vmem:[#allocation2 + $0x8] sm:$0xff]  ;;  %v865_v28 = vld [vmem:[#allocation7 + $0x40] ss:$8 sps:$4 sm:$0xff]   ;;  %v869_v32 = vld [vmem:[#allocation7 + $0x64] ss:$8 sps:$4 sm:$0xff]   ;;  %v231_v63 = vshrl.u32 %v230_v62, 7 }
  0x54   :  { %188 = vmatpush1.bf16.msra.mxu0 %v835_v6  ;;  %457 = vmatpush1.bf16.msra.mxu1 %v856_v14  ;;  %v866_v29 = vld [vmem:[#allocation7 + $0x54] ss:$8 sps:$4 sm:$0xff]   ;;  %v868_v30 = vld [vmem:[#allocation7 + $0x50] ss:$8 sps:$4 sm:$0xff]   ;;  %v86_v31 = vpack.c.bf16 %v85_v27, %v84_v26  ;;  %v871_v33 = vld [vmem:[#allocation7 + $0x60] ss:$8 sps:$4 sm:$0xff]  }
  0x55   :  { %189 = vmatprep.subr.bf16.mxu0 %v836_v7  ;;  %458 = vmatprep.subr.bf16.mxu1 %v857_v16  ;;  %v872_v34 = vld [vmem:[#allocation7 + $0x74] ss:$8 sps:$4 sm:$0xff]   ;;  %v874_v35 = vld [vmem:[#allocation7 + $0x70] ss:$8 sps:$4 sm:$0xff]   ;;  %v875_v36 = vld [vmem:[#allocation7 + $0x84] ss:$8 sps:$4 sm:$0xff]  }
  0x56   :  { %v877_v37 = vld [vmem:[#allocation7 + $0x80] ss:$8 sps:$4 sm:$0xff]   ;;  %v878_v38 = vld [vmem:[#allocation7 + $0x94] ss:$8 sps:$4 sm:$0xff]   ;;  %v880_v39 = vld [vmem:[#allocation7 + $0x90] ss:$8 sps:$4 sm:$0xff]  }
  0x57   :  { %v881_v40 = vld [vmem:[#allocation7 + $0xa4] ss:$8 sps:$4 sm:$0xff]   ;;  %v883_v41 = vld [vmem:[#allocation7 + $0xa0] ss:$8 sps:$4 sm:$0xff]   ;;  %v884_v42 = vld [vmem:[#allocation7 + $0xb4] ss:$8 sps:$4 sm:$0xff]  }
  0x58   :  { %190 = vmatpush1.bf16.msra.mxu0 %v838_v8  ;;  %459 = vmatpush1.bf16.msra.mxu1 %v859_v18  ;;  %v886_v43 = vld [vmem:[#allocation7 + $0xb0] ss:$8 sps:$4 sm:$0xff]   ;;  %v887_v44 = vld [vmem:[#allocation7 + $0xc4] ss:$8 sps:$4 sm:$0xff]   ;;  %v889_v45 = vld [vmem:[#allocation7 + $0xc0] ss:$8 sps:$4 sm:$0xff]  }
  0x59   :  { %191 = vmatprep.subr.bf16.mxu0 %v839_v9  ;;  %460 = vmatprep.subr.bf16.mxu1 %v860_v20  ;;  %v890_v46 = vld [vmem:[#allocation7 + $0xd4] ss:$8 sps:$4 sm:$0xff]   ;;  %v892_v47 = vld [vmem:[#allocation7 + $0xd0] ss:$8 sps:$4 sm:$0xff]   ;;  %v893_v48 = vld [vmem:[#allocation7 + $0xe4] ss:$8 sps:$4 sm:$0xff]  }
  0x5a   :  { %v895_v49 = vld [vmem:[#allocation7 + $0xe0] ss:$8 sps:$4 sm:$0xff]   ;;  %v896_v50 = vld [vmem:[#allocation7 + $0xf4] ss:$8 sps:$4 sm:$0xff]   ;;  %v898_v51 = vld [vmem:[#allocation7 + $0xf0] ss:$8 sps:$4 sm:$0xff]  }
  0x5b   :  { %v899_v52 = vld [vmem:[#allocation8 + $0x40] sm:$0xff]   ;;  %v901_v54 = vld [vmem:[#allocation8 + $0x48] sm:$0xff]   ;;  %v903_v56 = vld [vmem:[#allocation8 + $0x50] sm:$0xff]   ;;  %v232_v0 = vsub.s32 0, %v231_v63  ;;  %v236_v2 = vsub.s32 1, %v231_v63  ;;  %s1042_s9 = smov [#allocation10]  }
  0x5c   :  { %192 = vmatpush1.bf16.msra.mxu0 %v841_v13  ;;  %461 = vmatpush1.bf16.msra.mxu1 %v862_v22  ;;  %v900_v53 = vld [vmem:[#allocation8] sm:$0xff]   ;;  %v902_v55 = vld [vmem:[#allocation8 + $0x8] sm:$0xff]   ;;  %v904_v57 = vld [vmem:[#allocation8 + $0x10] sm:$0xff]   ;;  %s716_s10 = sshll.u32 %s1042_s9, 4  ;;  %s717_s10 = int_to_ptr.vmem [resolvable:$true] %s716_s10 }
  0x5d   :  { %193 = vmatprep.subr.bf16.mxu0 %v842_v15  ;;  %462 = vmatprep.subr.bf16.mxu1 %v863_v24  ;;  %v905_v58 = vld [vmem:[#allocation8 + $0x58] sm:$0xff]   ;;  %v907_v60 = vld [vmem:[#allocation8 + $0x60] sm:$0xff]   ;;  %v228_v1 = vld [vmem:[%s1180_s2] sm:$0x3]  ;;  %s1003_s11 = scalar_lea.vmem %s717_s10, 256  ;;  %p1008_p5 = scmp.lt.s32.totalorder %s717_s10, %s717_s10 }
  0x5e   :  { %v906_v59 = vld [vmem:[#allocation8 + $0x18] sm:$0xff]   ;;  %v908_v61 = vld [vmem:[#allocation8 + $0x20] sm:$0xff]   ;;  %v233_v3 = vrot.slane %v228_v1, %v232_v0  ;;  %v237_v4 = vrot.slane %v228_v1, %v236_v2  ;;  %v910_v24 = vld [vmem:[#allocation8 + $0x28] sm:$0xff]   ;;  %p1004_p4 = scmp.ne.s32.totalorder %s717_s10, %s1003_s11  ;;  %p1009_p6 = scmp.lt.s32.totalorder %s1003_s11, %s1003_s11 }
  0x5f   :  { %v912_v26 = vld [vmem:[#allocation8 + $0x30] sm:$0xff]   ;;  %v913_v27 = vld [vmem:[#allocation8 + $0x78] sm:$0xff]  }
  0x60   :  { %194 = vmatpush1.bf16.msra.mxu0 %v844_v17  ;;  %463 = vmatpush1.bf16.msra.mxu1 %v865_v28  ;;  %v240_v5 = vpack.c.bf16 %v233_v3, %v233_v3  ;;  %v241_v6 = vpack.c.bf16 %v237_v4, %v237_v4  ;;  %v914_v28 = vld [vmem:[#allocation8 + $0x38] sm:$0xff]   ;;  %p1010_p7 = por %p1009_p6, %p1008_p5 }
  0x61   :  { %195 = vmatprep.subr.bf16.mxu0 %v845_v19  ;;  %464 = vmatprep.subr.bf16.mxu1 %v866_v29  ;;  %v499_v29 = vld [vmem:[%s1182_s4] sm:$0x3] }
  0x62   :  { %v243_v7 = vpack.i.b16 %v240_v5, %v240_v5  ;;  %v250_v8 = vpack.i.b16 %v241_v6, %v241_v6  ;;  %p1011_p8 = pnand %p1010_p7, %p1004_p4 }
  0x64   :  { %196 = vmatpush1.bf16.msra.mxu0 %v847_v21  ;;  %465 = vmatpush1.bf16.msra.mxu1 %v868_v30  ;;  %v248_v11 = vrot.slane %v243_v7, %v232_v0  ;;  %v255_v13 = vrot.slane %v250_v8, %v232_v0  ;;  %v504_v30 = vrot.slane %v499_v29, %v232_v0 }
  0x65   :  { %197 = vmatprep.subr.bf16.mxu0 %v848_v23  ;;  %466 = vmatprep.subr.bf16.mxu1 %v869_v32  ;;  %v909_v23 = vld [vmem:[#allocation8 + $0x68] sm:$0xff]  }
  0x66   :  { %v511_v32 = vpack.c.bf16 %v504_v30, %v504_v30 }
  0x68   :  { %198 = vmatpush1.bf16.msra.mxu0 %v850_v25  ;;  %467 = vmatpush1.bf16.msra.mxu1 %v871_v33  ;;  %v911_v25 = vld [vmem:[#allocation8 + $0x70] sm:$0xff]  }
  0x69   :  { %468 = vmatprep.subr.bf16.mxu1 %v872_v34  ;;  %795 = vmatprep.subr.bf16.mxu0 %v899_v52  ;;  %v514_v34 = vpack.i.b16 %v511_v32, %v511_v32 }
  0x6b   :  { %216 = vmatmul.mubr.bf16.vlgmr.msra.gmra.mrb[0].mxu0 %v86_v31  ;;  %v508_v31 = vrot.slane %v499_v29, %v236_v2 }
  0x6c   :  { %469 = vmatpush1.bf16.msra.mxu1 %v874_v35  ;;  %796 = vmatpush3.bf16.msra.mxu0 %v900_v53 }
  0x6d   :  { %470 = vmatprep.subr.bf16.mxu1 %v875_v36  ;;  %797 = vmatprep.subr.bf16.mxu0 %v901_v54  ;;  %v512_v33 = vpack.c.bf16 %v508_v31, %v508_v31 }
  0x6f   :  { %v521_v35 = vpack.i.b16 %v512_v33, %v512_v33 }
  0x70   :  { %471 = vmatpush1.bf16.msra.mxu1 %v877_v37  ;;  %798 = vmatpush3.bf16.msra.mxu0 %v902_v55 }
  0x71   :  { %472 = vmatprep.subr.bf16.mxu1 %v878_v38  ;;  %799 = vmatprep.subr.bf16.mxu0 %v903_v56  ;;  %v519_v38 = vrot.slane %v514_v34, %v232_v0 }
  0x74   :  { %473 = vmatpush1.bf16.msra.mxu1 %v880_v39  ;;  %800 = vmatpush3.bf16.msra.mxu0 %v904_v57 }
  0x75   :  { %474 = vmatprep.subr.bf16.mxu1 %v881_v40  ;;  %801 = vmatprep.subr.bf16.mxu0 %v905_v58  ;;  %v526_v40 = vrot.slane %v521_v35, %v232_v0 }
  0x78   :  { %475 = vmatpush1.bf16.msra.mxu1 %v883_v41  ;;  %802 = vmatpush3.bf16.msra.mxu0 %v906_v59 }
  0x79   :  { %476 = vmatprep.subr.bf16.mxu1 %v884_v42  ;;  %803 = vmatprep.subr.bf16.mxu0 %v907_v60 }
  0x7c   :  { %477 = vmatpush1.bf16.msra.mxu1 %v886_v43  ;;  %804 = vmatpush3.bf16.msra.mxu0 %v908_v61 }
  0x7d   :  { %478 = vmatprep.subr.bf16.mxu1 %v887_v44  ;;  %805 = vmatprep.subr.bf16.mxu0 %v909_v23 }
  0x80   :  { %479 = vmatpush1.bf16.msra.mxu1 %v889_v45  ;;  %806 = vmatpush3.bf16.msra.mxu0 %v910_v24 }
  0x81   :  { %480 = vmatprep.subr.bf16.mxu1 %v890_v46  ;;  %807 = vmatprep.subr.bf16.mxu0 %v911_v25 }
  0x84   :  { %481 = vmatpush1.bf16.msra.mxu1 %v892_v47  ;;  %808 = vmatpush3.bf16.msra.mxu0 %v912_v26 }
  0x85   :  { %482 = vmatprep.subr.bf16.mxu1 %v893_v48  ;;  %809 = vmatprep.subr.bf16.mxu0 %v913_v27 }
  0x88   :  { %483 = vmatpush1.bf16.msra.mxu1 %v895_v49  ;;  %810 = vmatpush3.bf16.msra.mxu0 %v914_v28 }
  0x89   :  { %484 = vmatprep.subr.bf16.mxu1 %v896_v50 }
  0x8c   :  { %485 = vmatpush1.bf16.msra.mxu1 %v898_v51  ;;  %v778_v51 = vld [vmem:[%s1184_s6] ss:$0 sm:$0xff] }
 0x13e   :  { %v217_v9 = vpop.f32.mrb[0].mxu0 }
 0x13f   :  { %v219_v10 = vpop.f32.mrb[1].mxu0 }
 0x140   :  { %v221_v12 = vpop.f32.mrb[2].mxu0 }
 0x141   :  { %v226_v14 = vpack.c.bf16 %v221_v12, %v217_v9  ;;  %v223_v15 = vpop.f32.mrb[3].mxu0 }
 0x142   :  { %v227_v16 = vpack.c.bf16 %v223_v15, %v219_v10 }
 0x143   :  { %v256_v17 = vadd.bf16 %v248_v11, %v226_v14 }
 0x144   :  { %v257_v18 = vadd.bf16 %v255_v13, %v227_v16 }
 0x145   :  { %v258_v19 = vmul.bf16 1045249613, %v256_v17 }
 0x146   :  { %v259_v20 = vmul.bf16 1045249613, %v257_v18 }
 0x147   :  { %v260_v22 = vmax.bf16 %v258_v19, %v256_v17 }
 0x148   :  { %v261_v21 = vmax.bf16 %v259_v20, %v257_v18 }
 0x14a   :  { %486 = vmatprep.mubr.bf16.mxu1 %v261_v21 }
 0x14b   :  { %487 = vmatmul.mubr.bf16.vlgmr.msra.gmra.mrb[0].mxu1 %v260_v22 }
 0x21e   :  { %v488_v36 = vpop.f32.mrb[0].mxu1 }
 0x21f   :  { %v490_v37 = vpop.f32.mrb[1].mxu1 }
 0x220   :  { %v492_v39 = vpop.f32.mrb[2].mxu1 }
 0x221   :  { %v497_v41 = vpack.c.bf16 %v492_v39, %v488_v36  ;;  %v494_v42 = vpop.f32.mrb[3].mxu1 }
 0x222   :  { %v498_v43 = vpack.c.bf16 %v494_v42, %v490_v37 }
 0x223   :  { %v527_v44 = vadd.bf16 %v519_v38, %v497_v41 }
 0x224   :  { %v528_v45 = vadd.bf16 %v526_v40, %v498_v43 }
 0x225   :  { %v529_v46 = vmul.bf16 1045249613, %v527_v44 }
 0x226   :  { %v530_v47 = vmul.bf16 1045249613, %v528_v45 }
 0x227   :  { %v531_v49 = vmax.bf16 %v529_v46, %v527_v44 }
 0x228   :  { %v532_v48 = vmax.bf16 %v530_v47, %v528_v45 }
 0x22a   :  { %700 = vmatprep.mubr.bf16.mxu0 %v532_v48 }
 0x22b   :  { %701 = vmatmul.mubr.bf16.vlgmr.msra.gmra.mrb[4].mxu0 %v531_v49 }
 0x2fe   :  { %v811_v50 = vpop.f32.mrb[4].mxu0 }
 0x2ff   :  { %v812_v52 = vpop.f32.mrb[5].mxu0 }
 0x300   :  { %v813_v53 = vadd.f32 %v812_v52, %v811_v50  ;;  %v814_v54 = vpop.f32.mrb[6].mxu0 }
 0x301   :  { %v815_v55 = vpop.f32.mrb[7].mxu0 }
 0x302   :  { %v703_v56 = vadd.f32 %v813_v53, %v778_v51  ;;  %v816_v57 = vadd.f32 %v815_v55, %v814_v54 }
 0x304   :  { %709 = vst [vmem:[#allocation10] sm:$0xff] %v703_v56  ;;  %v706_v58 = vadd.f32 %v816_v57, %v778_v51 }
 0x306   :  { %710 = vst [vmem:[#allocation10 + $0x8] sm:$0xff] %v706_v58 }
 0x307   :  { %1014 = shalt.err (!%p1011_p8)
}
 0x308   :  { %s1015_s15 = scalar_lea.hbm %s1185_s7, 256 }
 0x309   :  { %p1016_p9 = scmp.ne.s32.totalorder %s1185_s7, %s1015_s15  ;;  %p1019_p10 = scmp.lt.u32.totalorder %s1015_s15, %s1185_s7 }
 0x30b   :  { %p1021_p11 = pnand %p1019_p10, %p1016_p9 }
 0x30d   :  { %1024 = shalt.err (!%p1021_p11)
}
 0x30e   :  { %722 = dma.vmem_to_hbm [thread:$0]  %s717_s10, 256, %s1185_s7, [#allocation4], %s1035_s13, %s1035_s13, %s1036_s14  }
 0x30f   :  { %1031 = dma.done.wait [#allocation4], 256  }
 0x310   :  { %1032 = vsyncadd [#allocation4], 4294967040 }
 0x311   :  { %726 = vsyncpa [#allocation3], 1 }
 0x312   :  { %727 = vsyncpa [#allocation6], 1 }
 0x313   :  { %728 = vsyncpa [#allocation9], 1 }
 0x314   :  { %729 = vsyncpa [#allocation4], 1 }

</bundles_post_ra>
